<compile_context>
chip_gen: v6e
topology: v6e:2x2x1
jax: 0.10.0
libtpu: 0.0.40
codegen_flags: <defaults>
</compile_context>

<pallas_src>
import re
import numpy as np

import jax
import jax.numpy as jnp
from jax import lax
from jax.experimental import pallas as pl
from jax.experimental.pallas import tpu as pltpu


def _round_up(x, m):
    return ((x + m - 1) // m) * m


def _gather_kernel(idx_ref, n_ref, table_hbm, out_ref, sem):
    # idx_ref:   SMEM (n_pad,) int32  -- scalar-prefetched row indices
    # n_ref:     SMEM (1,)     int32  -- true (un-padded) number of rows
    # table_hbm: HBM  (V, dim)        -- embedding table, never staged into VMEM
    # out_ref:   VMEM (tm, dim)       -- output tile for grid step i
    # sem:       DMA semaphore shared by all of this step's row copies
    i = pl.program_id(0)
    tm = out_ref.shape[0]
    base = i * tm                                     # hoisted scalar
    rows_live = jnp.minimum(tm, n_ref[0] - base)      # valid rows in this tile

    # Fast path: full tile. Un-gated, unrolled starts + ONE aggregated wait.
    @pl.when(rows_live == tm)
    def _full_tile():
        def start(r, carry):
            row = idx_ref[base + r]
            pltpu.make_async_copy(table_hbm.at[row], out_ref.at[r], sem).start()
            return carry

        lax.fori_loop(0, tm, start, 0, unroll=True)
        # Tile-sized descriptor: retires all tm single-row copies at once.
        pltpu.make_async_copy(table_hbm.at[pl.ds(0, tm)], out_ref, sem).wait()

    # Tail tile (at most one per call): gate padded rows so they generate no
    # HBM traffic / descriptors, then retire exactly the rows that started.
    @pl.when(rows_live < tm)
    def _tail_tile():
        def start(r, carry):
            @pl.when(r < rows_live)
            def _():
                row = idx_ref[base + r]
                pltpu.make_async_copy(table_hbm.at[row], out_ref.at[r], sem).start()
            return carry

        lax.fori_loop(0, tm, start, 0, unroll=True)

        def wait_one(r, carry):
            # Single-row descriptor: exactly the byte count of each started copy.
            pltpu.make_async_copy(table_hbm.at[0], out_ref.at[0], sem).wait()
            return carry

        lax.fori_loop(0, rows_live, wait_one, 0)


def pallas_gather(table, idx_padded, n_actual, tm):
    """Gather rows `idx_padded[:n_actual]` from HBM-resident `table` -> (n_pad, dim)."""
    n_pad = int(idx_padded.shape[0])
    V, dim = table.shape
    assert n_pad % tm == 0 and tm % 8 == 0

    n_arr = jnp.asarray([n_actual], dtype=jnp.int32)

    return pl.pallas_call(
        _gather_kernel,
        out_shape=jax.ShapeDtypeStruct((n_pad, dim), table.dtype),
        grid_spec=pltpu.PrefetchScalarGridSpec(
            num_scalar_prefetch=2,
            grid=(n_pad // tm,),
            in_specs=[pl.BlockSpec(memory_space=pl.ANY)],   # table stays in HBM
            out_specs=pl.BlockSpec((tm, dim), lambda i, idx_ref, n_ref: (i, 0)),
            scratch_shapes=[pltpu.SemaphoreType.DMA(())],
        ),
        compiler_params=pltpu.CompilerParams(
            dimension_semantics=("parallel",)),
    )(idx_padded, n_arr, table)


class ReadGOVecFromFile:
    """JAX/Pallas port of ReadGOVecFromFile.

    forward(go_terms) reproduces the reference semantics: per-term dict lookup
    with a 'GO:'-stripping fallback, returning a (len(go_terms), dim) array of
    the looked-up vectors.
    """

    def __init__(self, go_names, dim=300, seed=0):
        self.dim = dim
        # TODO(synk): original reads vectors from a .tsv / .pickle file; the
        # table is synthesized deterministically here (no file I/O in-script).
        key = jax.random.PRNGKey(seed)
        self.table = jax.random.normal(key, (len(go_names), dim), jnp.float32)
        self.go_dict = {name: i for i, name in enumerate(go_names)}

    @staticmethod
    def _choose_tm(n, tm_max=256):
        # >=2 grid steps where possible so v7x's 2 TensorCores both get work;
        # cap at tm_max (large tiles amortize the ~0.35us per-step overhead).
        half = max(1, (n + 1) // 2)
        return max(8, min(tm_max, _round_up(half, 8)))

    def forward(self, go_terms, tm_max=256):
        # String handling (dict membership + re.sub) has no TPU equivalent; it
        # only resolves each term to a table row index.  Gather runs in Pallas.
        if len(go_terms) == 0:
            return jnp.zeros((0, self.dim), jnp.float32)
        rows = []
        for go in go_terms:
            if go not in self.go_dict:
                rows.append(self.go_dict[re.sub('GO:', '', go)])
            else:
                rows.append(self.go_dict[go])
        n = len(rows)
        tm = self._choose_tm(n, tm_max)
        n_pad = _round_up(n, tm)
        # Host-side pad; padded slots are never DMA'd (gated in-kernel by n).
        # TODO(synk): optional further win -- coalesce consecutive/duplicate
        # indices host-side into multi-row DMAs (fewer descriptors).
        idx = jnp.asarray(rows + [0] * (n_pad - n), dtype=jnp.int32)

        out = pallas_gather(self.table, idx, n, tm)
        # NOTE: reference materializes float64 (np.zeros default); TPU path is f32.
        return out[:n]


if __name__ == "__main__":
    # Small synthetic GO vocabulary: every 3rd name is stored WITHOUT the
    # "GO:" prefix, so querying with "GO:xxxxxxx" exercises the fallback path.
    vocab = 16
    dim = 300
    stored_names = [
        (f"{i:07d}" if i % 3 == 0 else f"GO:{i:07d}") for i in range(vocab)
    ]
    module = ReadGOVecFromFile(stored_names, dim=dim, seed=0)

    # Query terms (always prefixed); n=10 -> tm=8, 2 grid steps: one full tile
    # (aggregated-wait path) and one tail tile (gated path) are both exercised.
    go_terms = [f"GO:{i:07d}" for i in [0, 3, 1, 7, 12, 5, 9, 2, 15, 4]]

    out = jax.block_until_ready(module.forward(go_terms))

    # Pure-Python/NumPy reference of the original forward semantics.
    table_np = np.asarray(module.table)
    ref = np.zeros((len(go_terms), dim), dtype=np.float32)
    for index, go in enumerate(go_terms):
        if go not in module.go_dict:
            ref[index] = table_np[module.go_dict[re.sub('GO:', '', go)]]
        else:
            ref[index] = table_np[module.go_dict[go]]

    assert out.shape == (len(go_terms), dim)
    assert out.dtype == jnp.float32
    np.testing.assert_array_equal(np.asarray(out), ref)
    print("KERNEL_OK")
</pallas_src>

<mosaic_0001>
module attributes {stable_mosaic.version = 11 : i64} {
  func.func @_gather_kernel(%arg0: i32, %arg1: memref<16xi32, #tpu.memory_space<smem>>, %arg2: memref<1xi32, #tpu.memory_space<smem>>, %arg3: memref<16x300xf32, #tpu.memory_space<any>>, %arg4: memref<8x300xf32, #tpu.memory_space<vmem>>, %arg5: memref<!tpu.dma_semaphore, #tpu.memory_space<semaphore_mem>>) attributes {dimension_semantics = [#tpu.dimension_semantics<parallel>], iteration_bounds = array<i64: 2>, scalar_prefetch = 2 : i64, scratch_operands = 1 : i64, tpu.core_type = #tpu.core_type<tc>, window_params = [{}, {transform_indices = @transform_1, window_bounds = array<i64: 8, 300>}]} {
    %c8_i32 = arith.constant 8 : i32
    %0 = arith.muli %arg0, %c8_i32 : i32
    %c0 = arith.constant 0 : index
    %1 = memref.load %arg2[%c0] : memref<1xi32, #tpu.memory_space<smem>>
    %2 = arith.subi %1, %0 : i32
    %c8_i32_0 = arith.constant 8 : i32
    %3 = arith.minsi %c8_i32_0, %2 : i32
    %c8_i32_1 = arith.constant 8 : i32
    %4 = arith.cmpi eq, %3, %c8_i32_1 : i32
    %5 = arith.extui %4 : i1 to i32
    %c0_i32 = arith.constant 0 : i32
    %6 = arith.cmpi ne, %5, %c0_i32 : i32
    scf.if %6 {
      %c0_i32_4 = arith.constant 0 : i32
      %10 = arith.addi %0, %c0_i32_4 : i32
      %11 = arith.index_cast %10 : i32 to index
      %12 = memref.load %arg1[%11] : memref<16xi32, #tpu.memory_space<smem>>
      %c0_i32_5 = arith.constant 0 : i32
      %13 = tpu.memref_slice %arg3[%12, %c0_i32_5] : memref<16x300xf32, #tpu.memory_space<any>> -> memref<1x300xf32, #tpu.memory_space<any>>
      %14 = tpu.memref_squeeze %13 : memref<1x300xf32, #tpu.memory_space<any>> -> memref<300xf32, #tpu.memory_space<any>>
      %c0_i32_6 = arith.constant 0 : i32
      %15 = tpu.memref_slice %arg4[%c0_i32_4, %c0_i32_6] : memref<8x300xf32, #tpu.memory_space<vmem>> -> memref<1x300xf32, #tpu.memory_space<vmem>>
      %16 = tpu.memref_squeeze %15 : memref<1x300xf32, #tpu.memory_space<vmem>> -> memref<300xf32, #tpu.memory_space<vmem>>
      tpu.enqueue_dma source(%14 : memref<300xf32, #tpu.memory_space<any>>) target(%16 : memref<300xf32, #tpu.memory_space<vmem>>) target_semaphore(%arg5 : memref<!tpu.dma_semaphore, #tpu.memory_space<semaphore_mem>>)
      %c1_i32 = arith.constant 1 : i32
      %17 = arith.addi %0, %c1_i32 : i32
      %18 = arith.index_cast %17 : i32 to index
      %19 = memref.load %arg1[%18] : memref<16xi32, #tpu.memory_space<smem>>
      %c0_i32_7 = arith.constant 0 : i32
      %20 = tpu.memref_slice %arg3[%19, %c0_i32_7] : memref<16x300xf32, #tpu.memory_space<any>> -> memref<1x300xf32, #tpu.memory_space<any>>
      %21 = tpu.memref_squeeze %20 : memref<1x300xf32, #tpu.memory_space<any>> -> memref<300xf32, #tpu.memory_space<any>>
      %c0_i32_8 = arith.constant 0 : i32
      %22 = tpu.memref_slice %arg4[%c1_i32, %c0_i32_8] : memref<8x300xf32, #tpu.memory_space<vmem>> -> memref<1x300xf32, #tpu.memory_space<vmem>>
      %23 = tpu.memref_squeeze %22 : memref<1x300xf32, #tpu.memory_space<vmem>> -> memref<300xf32, #tpu.memory_space<vmem>>
      tpu.enqueue_dma source(%21 : memref<300xf32, #tpu.memory_space<any>>) target(%23 : memref<300xf32, #tpu.memory_space<vmem>>) target_semaphore(%arg5 : memref<!tpu.dma_semaphore, #tpu.memory_space<semaphore_mem>>)
      %c2_i32 = arith.constant 2 : i32
      %24 = arith.addi %0, %c2_i32 : i32
      %25 = arith.index_cast %24 : i32 to index
      %26 = memref.load %arg1[%25] : memref<16xi32, #tpu.memory_space<smem>>
      %c0_i32_9 = arith.constant 0 : i32
      %27 = tpu.memref_slice %arg3[%26, %c0_i32_9] : memref<16x300xf32, #tpu.memory_space<any>> -> memref<1x300xf32, #tpu.memory_space<any>>
      %28 = tpu.memref_squeeze %27 : memref<1x300xf32, #tpu.memory_space<any>> -> memref<300xf32, #tpu.memory_space<any>>
      %c0_i32_10 = arith.constant 0 : i32
      %29 = tpu.memref_slice %arg4[%c2_i32, %c0_i32_10] : memref<8x300xf32, #tpu.memory_space<vmem>> -> memref<1x300xf32, #tpu.memory_space<vmem>>
      %30 = tpu.memref_squeeze %29 : memref<1x300xf32, #tpu.memory_space<vmem>> -> memref<300xf32, #tpu.memory_space<vmem>>
      tpu.enqueue_dma source(%28 : memref<300xf32, #tpu.memory_space<any>>) target(%30 : memref<300xf32, #tpu.memory_space<vmem>>) target_semaphore(%arg5 : memref<!tpu.dma_semaphore, #tpu.memory_space<semaphore_mem>>)
      %c3_i32 = arith.constant 3 : i32
      %31 = arith.addi %0, %c3_i32 : i32
      %32 = arith.index_cast %31 : i32 to index
      %33 = memref.load %arg1[%32] : memref<16xi32, #tpu.memory_space<smem>>
      %c0_i32_11 = arith.constant 0 : i32
      %34 = tpu.memref_slice %arg3[%33, %c0_i32_11] : memref<16x300xf32, #tpu.memory_space<any>> -> memref<1x300xf32, #tpu.memory_space<any>>
      %35 = tpu.memref_squeeze %34 : memref<1x300xf32, #tpu.memory_space<any>> -> memref<300xf32, #tpu.memory_space<any>>
      %c0_i32_12 = arith.constant 0 : i32
      %36 = tpu.memref_slice %arg4[%c3_i32, %c0_i32_12] : memref<8x300xf32, #tpu.memory_space<vmem>> -> memref<1x300xf32, #tpu.memory_space<vmem>>
      %37 = tpu.memref_squeeze %36 : memref<1x300xf32, #tpu.memory_space<vmem>> -> memref<300xf32, #tpu.memory_space<vmem>>
      tpu.enqueue_dma source(%35 : memref<300xf32, #tpu.memory_space<any>>) target(%37 : memref<300xf32, #tpu.memory_space<vmem>>) target_semaphore(%arg5 : memref<!tpu.dma_semaphore, #tpu.memory_space<semaphore_mem>>)
      %c4_i32 = arith.constant 4 : i32
      %38 = arith.addi %0, %c4_i32 : i32
      %39 = arith.index_cast %38 : i32 to index
      %40 = memref.load %arg1[%39] : memref<16xi32, #tpu.memory_space<smem>>
      %c0_i32_13 = arith.constant 0 : i32
      %41 = tpu.memref_slice %arg3[%40, %c0_i32_13] : memref<16x300xf32, #tpu.memory_space<any>> -> memref<1x300xf32, #tpu.memory_space<any>>
      %42 = tpu.memref_squeeze %41 : memref<1x300xf32, #tpu.memory_space<any>> -> memref<300xf32, #tpu.memory_space<any>>
      %c0_i32_14 = arith.constant 0 : i32
      %43 = tpu.memref_slice %arg4[%c4_i32, %c0_i32_14] : memref<8x300xf32, #tpu.memory_space<vmem>> -> memref<1x300xf32, #tpu.memory_space<vmem>>
      %44 = tpu.memref_squeeze %43 : memref<1x300xf32, #tpu.memory_space<vmem>> -> memref<300xf32, #tpu.memory_space<vmem>>
      tpu.enqueue_dma source(%42 : memref<300xf32, #tpu.memory_space<any>>) target(%44 : memref<300xf32, #tpu.memory_space<vmem>>) target_semaphore(%arg5 : memref<!tpu.dma_semaphore, #tpu.memory_space<semaphore_mem>>)
      %c5_i32 = arith.constant 5 : i32
      %45 = arith.addi %0, %c5_i32 : i32
      %46 = arith.index_cast %45 : i32 to index
      %47 = memref.load %arg1[%46] : memref<16xi32, #tpu.memory_space<smem>>
      %c0_i32_15 = arith.constant 0 : i32
      %48 = tpu.memref_slice %arg3[%47, %c0_i32_15] : memref<16x300xf32, #tpu.memory_space<any>> -> memref<1x300xf32, #tpu.memory_space<any>>
      %49 = tpu.memref_squeeze %48 : memref<1x300xf32, #tpu.memory_space<any>> -> memref<300xf32, #tpu.memory_space<any>>
      %c0_i32_16 = arith.constant 0 : i32
      %50 = tpu.memref_slice %arg4[%c5_i32, %c0_i32_16] : memref<8x300xf32, #tpu.memory_space<vmem>> -> memref<1x300xf32, #tpu.memory_space<vmem>>
      %51 = tpu.memref_squeeze %50 : memref<1x300xf32, #tpu.memory_space<vmem>> -> memref<300xf32, #tpu.memory_space<vmem>>
      tpu.enqueue_dma source(%49 : memref<300xf32, #tpu.memory_space<any>>) target(%51 : memref<300xf32, #tpu.memory_space<vmem>>) target_semaphore(%arg5 : memref<!tpu.dma_semaphore, #tpu.memory_space<semaphore_mem>>)
      %c6_i32 = arith.constant 6 : i32
      %52 = arith.addi %0, %c6_i32 : i32
      %53 = arith.index_cast %52 : i32 to index
      %54 = memref.load %arg1[%53] : memref<16xi32, #tpu.memory_space<smem>>
      %c0_i32_17 = arith.constant 0 : i32
      %55 = tpu.memref_slice %arg3[%54, %c0_i32_17] : memref<16x300xf32, #tpu.memory_space<any>> -> memref<1x300xf32, #tpu.memory_space<any>>
      %56 = tpu.memref_squeeze %55 : memref<1x300xf32, #tpu.memory_space<any>> -> memref<300xf32, #tpu.memory_space<any>>
      %c0_i32_18 = arith.constant 0 : i32
      %57 = tpu.memref_slice %arg4[%c6_i32, %c0_i32_18] : memref<8x300xf32, #tpu.memory_space<vmem>> -> memref<1x300xf32, #tpu.memory_space<vmem>>
      %58 = tpu.memref_squeeze %57 : memref<1x300xf32, #tpu.memory_space<vmem>> -> memref<300xf32, #tpu.memory_space<vmem>>
      tpu.enqueue_dma source(%56 : memref<300xf32, #tpu.memory_space<any>>) target(%58 : memref<300xf32, #tpu.memory_space<vmem>>) target_semaphore(%arg5 : memref<!tpu.dma_semaphore, #tpu.memory_space<semaphore_mem>>)
      %c7_i32 = arith.constant 7 : i32
      %59 = arith.addi %0, %c7_i32 : i32
      %60 = arith.index_cast %59 : i32 to index
      %61 = memref.load %arg1[%60] : memref<16xi32, #tpu.memory_space<smem>>
      %c0_i32_19 = arith.constant 0 : i32
      %62 = tpu.memref_slice %arg3[%61, %c0_i32_19] : memref<16x300xf32, #tpu.memory_space<any>> -> memref<1x300xf32, #tpu.memory_space<any>>
      %63 = tpu.memref_squeeze %62 : memref<1x300xf32, #tpu.memory_space<any>> -> memref<300xf32, #tpu.memory_space<any>>
      %c0_i32_20 = arith.constant 0 : i32
      %64 = tpu.memref_slice %arg4[%c7_i32, %c0_i32_20] : memref<8x300xf32, #tpu.memory_space<vmem>> -> memref<1x300xf32, #tpu.memory_space<vmem>>
      %65 = tpu.memref_squeeze %64 : memref<1x300xf32, #tpu.memory_space<vmem>> -> memref<300xf32, #tpu.memory_space<vmem>>
      tpu.enqueue_dma source(%63 : memref<300xf32, #tpu.memory_space<any>>) target(%65 : memref<300xf32, #tpu.memory_space<vmem>>) target_semaphore(%arg5 : memref<!tpu.dma_semaphore, #tpu.memory_space<semaphore_mem>>)
      %c8_i32_21 = arith.constant 8 : i32
      %c0_i32_22 = arith.constant 0 : i32
      %c0_i32_23 = arith.constant 0 : i32
      %66 = tpu.memref_slice %arg3[%c0_i32_22, %c0_i32_23] : memref<16x300xf32, #tpu.memory_space<any>> -> memref<8x300xf32, #tpu.memory_space<any>>
      tpu.wait_dma2 semaphore(%arg5 : memref<!tpu.dma_semaphore, #tpu.memory_space<semaphore_mem>>) src(%66 : memref<8x300xf32, #tpu.memory_space<any>>) dst(%arg4 : memref<8x300xf32, #tpu.memory_space<vmem>>)
    } else {
    }
    %c8_i32_2 = arith.constant 8 : i32
    %7 = arith.cmpi slt, %3, %c8_i32_2 : i32
    %8 = arith.extui %7 : i1 to i32
    %c0_i32_3 = arith.constant 0 : i32
    %9 = arith.cmpi ne, %8, %c0_i32_3 : i32
    scf.if %9 {
      %c0_i32_4 = arith.constant 0 : i32
      %10 = arith.cmpi slt, %c0_i32_4, %3 : i32
      %11 = arith.extui %10 : i1 to i32
      %c0_i32_5 = arith.constant 0 : i32
      %12 = arith.cmpi ne, %11, %c0_i32_5 : i32
      scf.if %12 {
        %36 = arith.addi %0, %c0_i32_4 : i32
        %37 = arith.index_cast %36 : i32 to index
        %38 = memref.load %arg1[%37] : memref<16xi32, #tpu.memory_space<smem>>
        %c0_i32_17 = arith.constant 0 : i32
        %39 = tpu.memref_slice %arg3[%38, %c0_i32_17] : memref<16x300xf32, #tpu.memory_space<any>> -> memref<1x300xf32, #tpu.memory_space<any>>
        %40 = tpu.memref_squeeze %39 : memref<1x300xf32, #tpu.memory_space<any>> -> memref<300xf32, #tpu.memory_space<any>>
        %c0_i32_18 = arith.constant 0 : i32
        %41 = tpu.memref_slice %arg4[%c0_i32_4, %c0_i32_18] : memref<8x300xf32, #tpu.memory_space<vmem>> -> memref<1x300xf32, #tpu.memory_space<vmem>>
        %42 = tpu.memref_squeeze %41 : memref<1x300xf32, #tpu.memory_space<vmem>> -> memref<300xf32, #tpu.memory_space<vmem>>
        tpu.enqueue_dma source(%40 : memref<300xf32, #tpu.memory_space<any>>) target(%42 : memref<300xf32, #tpu.memory_space<vmem>>) target_semaphore(%arg5 : memref<!tpu.dma_semaphore, #tpu.memory_space<semaphore_mem>>)
      } else {
      }
      %c1_i32 = arith.constant 1 : i32
      %13 = arith.cmpi slt, %c1_i32, %3 : i32
      %14 = arith.extui %13 : i1 to i32
      %c0_i32_6 = arith.constant 0 : i32
      %15 = arith.cmpi ne, %14, %c0_i32_6 : i32
      scf.if %15 {
        %36 = arith.addi %0, %c1_i32 : i32
        %37 = arith.index_cast %36 : i32 to index
        %38 = memref.load %arg1[%37] : memref<16xi32, #tpu.memory_space<smem>>
        %c0_i32_17 = arith.constant 0 : i32
        %39 = tpu.memref_slice %arg3[%38, %c0_i32_17] : memref<16x300xf32, #tpu.memory_space<any>> -> memref<1x300xf32, #tpu.memory_space<any>>
        %40 = tpu.memref_squeeze %39 : memref<1x300xf32, #tpu.memory_space<any>> -> memref<300xf32, #tpu.memory_space<any>>
        %c0_i32_18 = arith.constant 0 : i32
        %41 = tpu.memref_slice %arg4[%c1_i32, %c0_i32_18] : memref<8x300xf32, #tpu.memory_space<vmem>> -> memref<1x300xf32, #tpu.memory_space<vmem>>
        %42 = tpu.memref_squeeze %41 : memref<1x300xf32, #tpu.memory_space<vmem>> -> memref<300xf32, #tpu.memory_space<vmem>>
        tpu.enqueue_dma source(%40 : memref<300xf32, #tpu.memory_space<any>>) target(%42 : memref<300xf32, #tpu.memory_space<vmem>>) target_semaphore(%arg5 : memref<!tpu.dma_semaphore, #tpu.memory_space<semaphore_mem>>)
      } else {
      }
      %c2_i32 = arith.constant 2 : i32
      %16 = arith.cmpi slt, %c2_i32, %3 : i32
      %17 = arith.extui %16 : i1 to i32
      %c0_i32_7 = arith.constant 0 : i32
      %18 = arith.cmpi ne, %17, %c0_i32_7 : i32
      scf.if %18 {
        %36 = arith.addi %0, %c2_i32 : i32
        %37 = arith.index_cast %36 : i32 to index
        %38 = memref.load %arg1[%37] : memref<16xi32, #tpu.memory_space<smem>>
        %c0_i32_17 = arith.constant 0 : i32
        %39 = tpu.memref_slice %arg3[%38, %c0_i32_17] : memref<16x300xf32, #tpu.memory_space<any>> -> memref<1x300xf32, #tpu.memory_space<any>>
        %40 = tpu.memref_squeeze %39 : memref<1x300xf32, #tpu.memory_space<any>> -> memref<300xf32, #tpu.memory_space<any>>
        %c0_i32_18 = arith.constant 0 : i32
        %41 = tpu.memref_slice %arg4[%c2_i32, %c0_i32_18] : memref<8x300xf32, #tpu.memory_space<vmem>> -> memref<1x300xf32, #tpu.memory_space<vmem>>
        %42 = tpu.memref_squeeze %41 : memref<1x300xf32, #tpu.memory_space<vmem>> -> memref<300xf32, #tpu.memory_space<vmem>>
        tpu.enqueue_dma source(%40 : memref<300xf32, #tpu.memory_space<any>>) target(%42 : memref<300xf32, #tpu.memory_space<vmem>>) target_semaphore(%arg5 : memref<!tpu.dma_semaphore, #tpu.memory_space<semaphore_mem>>)
      } else {
      }
      %c3_i32 = arith.constant 3 : i32
      %19 = arith.cmpi slt, %c3_i32, %3 : i32
      %20 = arith.extui %19 : i1 to i32
      %c0_i32_8 = arith.constant 0 : i32
      %21 = arith.cmpi ne, %20, %c0_i32_8 : i32
      scf.if %21 {
        %36 = arith.addi %0, %c3_i32 : i32
        %37 = arith.index_cast %36 : i32 to index
        %38 = memref.load %arg1[%37] : memref<16xi32, #tpu.memory_space<smem>>
        %c0_i32_17 = arith.constant 0 : i32
        %39 = tpu.memref_slice %arg3[%38, %c0_i32_17] : memref<16x300xf32, #tpu.memory_space<any>> -> memref<1x300xf32, #tpu.memory_space<any>>
        %40 = tpu.memref_squeeze %39 : memref<1x300xf32, #tpu.memory_space<any>> -> memref<300xf32, #tpu.memory_space<any>>
        %c0_i32_18 = arith.constant 0 : i32
        %41 = tpu.memref_slice %arg4[%c3_i32, %c0_i32_18] : memref<8x300xf32, #tpu.memory_space<vmem>> -> memref<1x300xf32, #tpu.memory_space<vmem>>
        %42 = tpu.memref_squeeze %41 : memref<1x300xf32, #tpu.memory_space<vmem>> -> memref<300xf32, #tpu.memory_space<vmem>>
        tpu.enqueue_dma source(%40 : memref<300xf32, #tpu.memory_space<any>>) target(%42 : memref<300xf32, #tpu.memory_space<vmem>>) target_semaphore(%arg5 : memref<!tpu.dma_semaphore, #tpu.memory_space<semaphore_mem>>)
      } else {
      }
      %c4_i32 = arith.constant 4 : i32
      %22 = arith.cmpi slt, %c4_i32, %3 : i32
      %23 = arith.extui %22 : i1 to i32
      %c0_i32_9 = arith.constant 0 : i32
      %24 = arith.cmpi ne, %23, %c0_i32_9 : i32
      scf.if %24 {
        %36 = arith.addi %0, %c4_i32 : i32
        %37 = arith.index_cast %36 : i32 to index
        %38 = memref.load %arg1[%37] : memref<16xi32, #tpu.memory_space<smem>>
        %c0_i32_17 = arith.constant 0 : i32
        %39 = tpu.memref_slice %arg3[%38, %c0_i32_17] : memref<16x300xf32, #tpu.memory_space<any>> -> memref<1x300xf32, #tpu.memory_space<any>>
        %40 = tpu.memref_squeeze %39 : memref<1x300xf32, #tpu.memory_space<any>> -> memref<300xf32, #tpu.memory_space<any>>
        %c0_i32_18 = arith.constant 0 : i32
        %41 = tpu.memref_slice %arg4[%c4_i32, %c0_i32_18] : memref<8x300xf32, #tpu.memory_space<vmem>> -> memref<1x300xf32, #tpu.memory_space<vmem>>
        %42 = tpu.memref_squeeze %41 : memref<1x300xf32, #tpu.memory_space<vmem>> -> memref<300xf32, #tpu.memory_space<vmem>>
        tpu.enqueue_dma source(%40 : memref<300xf32, #tpu.memory_space<any>>) target(%42 : memref<300xf32, #tpu.memory_space<vmem>>) target_semaphore(%arg5 : memref<!tpu.dma_semaphore, #tpu.memory_space<semaphore_mem>>)
      } else {
      }
      %c5_i32 = arith.constant 5 : i32
      %25 = arith.cmpi slt, %c5_i32, %3 : i32
      %26 = arith.extui %25 : i1 to i32
      %c0_i32_10 = arith.constant 0 : i32
      %27 = arith.cmpi ne, %26, %c0_i32_10 : i32
      scf.if %27 {
        %36 = arith.addi %0, %c5_i32 : i32
        %37 = arith.index_cast %36 : i32 to index
        %38 = memref.load %arg1[%37] : memref<16xi32, #tpu.memory_space<smem>>
        %c0_i32_17 = arith.constant 0 : i32
        %39 = tpu.memref_slice %arg3[%38, %c0_i32_17] : memref<16x300xf32, #tpu.memory_space<any>> -> memref<1x300xf32, #tpu.memory_space<any>>
        %40 = tpu.memref_squeeze %39 : memref<1x300xf32, #tpu.memory_space<any>> -> memref<300xf32, #tpu.memory_space<any>>
        %c0_i32_18 = arith.constant 0 : i32
        %41 = tpu.memref_slice %arg4[%c5_i32, %c0_i32_18] : memref<8x300xf32, #tpu.memory_space<vmem>> -> memref<1x300xf32, #tpu.memory_space<vmem>>
        %42 = tpu.memref_squeeze %41 : memref<1x300xf32, #tpu.memory_space<vmem>> -> memref<300xf32, #tpu.memory_space<vmem>>
        tpu.enqueue_dma source(%40 : memref<300xf32, #tpu.memory_space<any>>) target(%42 : memref<300xf32, #tpu.memory_space<vmem>>) target_semaphore(%arg5 : memref<!tpu.dma_semaphore, #tpu.memory_space<semaphore_mem>>)
      } else {
      }
      %c6_i32 = arith.constant 6 : i32
      %28 = arith.cmpi slt, %c6_i32, %3 : i32
      %29 = arith.extui %28 : i1 to i32
      %c0_i32_11 = arith.constant 0 : i32
      %30 = arith.cmpi ne, %29, %c0_i32_11 : i32
      scf.if %30 {
        %36 = arith.addi %0, %c6_i32 : i32
        %37 = arith.index_cast %36 : i32 to index
        %38 = memref.load %arg1[%37] : memref<16xi32, #tpu.memory_space<smem>>
        %c0_i32_17 = arith.constant 0 : i32
        %39 = tpu.memref_slice %arg3[%38, %c0_i32_17] : memref<16x300xf32, #tpu.memory_space<any>> -> memref<1x300xf32, #tpu.memory_space<any>>
        %40 = tpu.memref_squeeze %39 : memref<1x300xf32, #tpu.memory_space<any>> -> memref<300xf32, #tpu.memory_space<any>>
        %c0_i32_18 = arith.constant 0 : i32
        %41 = tpu.memref_slice %arg4[%c6_i32, %c0_i32_18] : memref<8x300xf32, #tpu.memory_space<vmem>> -> memref<1x300xf32, #tpu.memory_space<vmem>>
        %42 = tpu.memref_squeeze %41 : memref<1x300xf32, #tpu.memory_space<vmem>> -> memref<300xf32, #tpu.memory_space<vmem>>
        tpu.enqueue_dma source(%40 : memref<300xf32, #tpu.memory_space<any>>) target(%42 : memref<300xf32, #tpu.memory_space<vmem>>) target_semaphore(%arg5 : memref<!tpu.dma_semaphore, #tpu.memory_space<semaphore_mem>>)
      } else {
      }
      %c7_i32 = arith.constant 7 : i32
      %31 = arith.cmpi slt, %c7_i32, %3 : i32
      %32 = arith.extui %31 : i1 to i32
      %c0_i32_12 = arith.constant 0 : i32
      %33 = arith.cmpi ne, %32, %c0_i32_12 : i32
      scf.if %33 {
        %36 = arith.addi %0, %c7_i32 : i32
        %37 = arith.index_cast %36 : i32 to index
        %38 = memref.load %arg1[%37] : memref<16xi32, #tpu.memory_space<smem>>
        %c0_i32_17 = arith.constant 0 : i32
        %39 = tpu.memref_slice %arg3[%38, %c0_i32_17] : memref<16x300xf32, #tpu.memory_space<any>> -> memref<1x300xf32, #tpu.memory_space<any>>
        %40 = tpu.memref_squeeze %39 : memref<1x300xf32, #tpu.memory_space<any>> -> memref<300xf32, #tpu.memory_space<any>>
        %c0_i32_18 = arith.constant 0 : i32
        %41 = tpu.memref_slice %arg4[%c7_i32, %c0_i32_18] : memref<8x300xf32, #tpu.memory_space<vmem>> -> memref<1x300xf32, #tpu.memory_space<vmem>>
        %42 = tpu.memref_squeeze %41 : memref<1x300xf32, #tpu.memory_space<vmem>> -> memref<300xf32, #tpu.memory_space<vmem>>
        tpu.enqueue_dma source(%40 : memref<300xf32, #tpu.memory_space<any>>) target(%42 : memref<300xf32, #tpu.memory_space<vmem>>) target_semaphore(%arg5 : memref<!tpu.dma_semaphore, #tpu.memory_space<semaphore_mem>>)
      } else {
      }
      %c8_i32_13 = arith.constant 8 : i32
      %c0_i32_14 = arith.constant 0 : i32
      %c0_i32_15 = arith.constant 0 : i32
      %34 = arith.subi %3, %c0_i32_15 : i32
      %35 = arith.addi %c0_i32_15, %34 : i32
      %c1_i32_16 = arith.constant 1 : i32
      scf.for %arg6 = %c0_i32_15 to %35 step %c1_i32_16  : i32 {
        %c0_i32_17 = arith.constant 0 : i32
        %c0_i32_18 = arith.constant 0 : i32
        %c0_i32_19 = arith.constant 0 : i32
        %36 = tpu.memref_slice %arg3[%c0_i32_17, %c0_i32_19] : memref<16x300xf32, #tpu.memory_space<any>> -> memref<1x300xf32, #tpu.memory_space<any>>
        %37 = tpu.memref_squeeze %36 : memref<1x300xf32, #tpu.memory_space<any>> -> memref<300xf32, #tpu.memory_space<any>>
        %c0_i32_20 = arith.constant 0 : i32
        %38 = tpu.memref_slice %arg4[%c0_i32_18, %c0_i32_20] : memref<8x300xf32, #tpu.memory_space<vmem>> -> memref<1x300xf32, #tpu.memory_space<vmem>>
        %39 = tpu.memref_squeeze %38 : memref<1x300xf32, #tpu.memory_space<vmem>> -> memref<300xf32, #tpu.memory_space<vmem>>
        tpu.wait_dma2 semaphore(%arg5 : memref<!tpu.dma_semaphore, #tpu.memory_space<semaphore_mem>>) src(%37 : memref<300xf32, #tpu.memory_space<any>>) dst(%39 : memref<300xf32, #tpu.memory_space<vmem>>)
      }
    } else {
    }
    return
  }
  func.func @transform_1(%arg0: i32, %arg1: memref<16xi32, #tpu.memory_space<smem>>, %arg2: memref<1xi32, #tpu.memory_space<smem>>) -> (i32, i32) {
    %c0_i32 = arith.constant 0 : i32
    %c0_i32_0 = arith.constant 0 : i32
    return %arg0, %c0_i32 : i32, i32
  }
}

</mosaic_0001>

<bundles_post_ra>
// kernel: tpu_custom_call.1
= control target key start
LH: loop header
LB: loop body
LE: loop exit
PB: predicated region body
PF: predicated region fallthrough
CT: control target
= control target key end

     0   :  { %s1926_s0 = inlined_call_operand.vmem [shape: s32[16], index: 0, kind: input, shape index: {}]   ;;  %s1927_s1 = inlined_call_operand.<no memory space> [shape: s32[1], index: 1, kind: input, shape index: {}]   ;;  %s1928_s2 = inlined_call_operand.hbm [shape: f32[16,300], index: 2, kind: input, shape index: {}]   ;;  %s1929_s3 = inlined_call_operand.hbm [shape: f32[16,300], index: 3, kind: output, shape index: {}]  }
   0x1   :  { %1988 = sst [smem:[#allocation70_spill]] %s1929_s3  ;;  %s8_s14 = sshll.u32 %s1926_s0, 4  ;;  %s9_s14 = int_to_ptr.vmem [resolvable:$true] %s8_s14 }
   0x2   :  { %12 = sst [smem:[#allocation5]] %s1927_s1  ;;  %s636_s17 = scalar_lea.vmem %s9_s14, 16 }
   0x3   :  { %p637_p0 = scmp.ne.s32.totalorder %s9_s14, %s636_s17  ;;  %p641_p1 = scmp.lt.s32.totalorder %s9_s14, %s9_s14 }
   0x4   :  { %p642_p2 = scmp.lt.s32.totalorder %s636_s17, %s636_s17 }
   0x6   :  { %p643_p3 = por %p642_p2, %p641_p1 }
   0x8   :  { %p644_p4 = pnand %p643_p3, %p637_p0 }
   0xa   :  { %647 = shalt.err (!%p644_p4)  }
   0xb   :  { %s1134_s18 = smov [#allocation4]  }
   0xc   :  { %11 = dma.vmem_to_smem %s9_s14, 16, %s1134_s18, [#allocation3] }
   0xd   :  { %1106 = dma.done.wait [#allocation3], 16 }
   0xe   :  { %1107 = vsyncadd [#allocation3], 4294967280 }
   0xf   :  { %14 = sfence }
  0x10   :  { %15 = vsyncpa [#allocation7], 0 }
  0x11   :  { %17 = vsyncpa [#allocation7 + $0x1], 0  ;;  %s1166_s0 = smov 0   ;;  %s1168_s19 = smov 0  }
  0x12   :  { %s1170_s1 = smov 0  }
  0x13 LB: > { %1989 = sst [smem:[#allocation44_spill]] %s1120_s0  ;;  %s466_s20 = sadd.s32 4294967295, %s1128_s1   ;;  %s1128_s1 = sphi %s1170_s1, %s2117_s1   ;;  %s1124_s19 = sphi %s1168_s19, %s2119_s19   ;;  %s1120_s0 = sphi %s1166_s0, %s2118_s0  }
  0x14   : > { %1990 = sst [smem:[#allocation45_spill]] %s1124_s19  ;;  %s1183_s21 = sadd.s32 1, %s1128_s1  }
  0x15   : > { %1991 = sst [smem:[#allocation46_spill]] %s1128_s1  ;;  %s26_s22 = ssub.s32 %s1128_s1, %s1183_s21 }
  0x16   : > { %1992 = sst [smem:[#allocation47_spill]] %s1183_s21  ;;  %s29_s23 = sadd.s32 1, %s1124_s19 }
  0x17   : > { %p27_p5 = scmp.eq.s32.totalorder %s26_s22, 0  ;;  %p467_p6 = scmp.ne.s32.totalorder %s26_s22, 0 }
  0x18   : > { %p33_p7 = scmp.eq.s32.totalorder %s1128_s1, 1  ;;  %p38_p8 = scmp.ne.s32.totalorder %s1124_s19, %s1120_s0 }
  0x19   : > { %s1192_s24 = scalar_select %p27_p5, %s1124_s19, %s29_s23  }
  0x1a   : > { %p1194_p9 = por %p467_p6, %p33_p7  ;;  %p39_p10 = scmp.eq.s32.totalorder %s466_s20, 1 }
  0x1b   : > { %1993 = sst [smem:[#allocation48_spill]] %s1192_s24  ;;  %p468_p12 = scmp.ge.s32.totalorder %s1128_s1, 2 }
  0x1c   : > { %s1994_s25 = scalar_select %p1194_p9, 1, 0 }
  0x1d   : > { %p1198_p11 = por %p39_p10, %p38_p8  ;;  %48 = sbr.rel (%p468_p12) target bundleno = 585 (0x249), region = 12 }
  0x1e   : > { %1995 = sst [smem:[#allocation49_spill]] %s1994_s25 }
  0x1f   : > { %s1996_s26 = scalar_select %p1198_p11, 1, 0 }
  0x21   : > { %1997 = sst [smem:[#allocation50_spill]] %s1996_s26 }
  0x22   : > { %s1930_s27 = sand.u32 1, %s1124_s19   ;;  %s57_s29 = sld [smem:[#allocation5]] }
  0x23   : > { %s539_s28 = smul.u32 24, %s1930_s27  ;;  %s1207_s30 = sshll.u32 %s1128_s1, 3 }
  0x24   : > { %s1931_s7 = sadd.s32 1, %s1207_s30  ;;  %s1935_s13 = sadd.s32 2, %s1207_s30 }
  0x25   : > { %s1209_s4 = scalar_lea.vmem [#allocation6], %s539_s28  ;;  %s1936_s14 = sadd.s32 3, %s1207_s30 }
  0x26   : > { %s85_s5 = scalar_lea.vmem %s1209_s4, 1 [#allocation6]  ;;  %s73_s6 = sshll.u32 %s1209_s4, 4  ;;  %s1219_s6 = int_to_ptr.vmem [resolvable:$true] %s73_s6 }
  0x27   : > { %s99_s9 = scalar_lea.vmem %s1209_s4, 2 [#allocation6]  ;;  %s87_s10 = sshll.u32 %s85_s5, 4  ;;  %s1226_s10 = int_to_ptr.vmem [resolvable:$true] %s87_s10 }
  0x28   : > { %s1215_s8 = ssub.s32 %s57_s29, %s1207_s30  ;;  %s101_s11 = sshll.u32 %s99_s9, 4  ;;  %s1230_s11 = int_to_ptr.vmem [resolvable:$true] %s101_s11 }
  0x29   : > { %p1946_p13 = scmp.lt.s32.totalorder %s1215_s8, 8  ;;  %1999 = sst [smem:[#allocation52_spill]] %s1230_s11 }
  0x2b   : > { %s1224_s12 = scalar_select %p1946_p13, %s1215_s8, 8 }
  0x2d   : > { %1998 = sst [smem:[#allocation51_spill]] %s1224_s12  ;;  %p597_p0 = scmp.eq.s32.totalorder %s1224_s12, 8 }
  0x2f   : > { %s542_s15 = scalar_select %p597_p0, [#allocation4], [#allocation24] }
  0x30   : > { %s543_s16 = scalar_select %p597_p0, %s1207_s30, 0 }
  0x31   : > { %s545_s17 = scalar_select %p597_p0, [#allocation4], [#allocation25] }
  0x32   : > { %s65_s18 = sld [smem:[%s542_s15 + %s543_s16]] }
  0x33   : > { %s546_s22 = scalar_select %p597_p0, %s1931_s7, 0 }
  0x34   : > { %s548_s23 = scalar_select %p597_p0, [#allocation4], [#allocation26] }
  0x35   : > { %s1247_s28 = sld [smem:[%s545_s17 + %s546_s22]] }
  0x36   : > { %s549_s5 = scalar_select %p597_p0, %s1935_s13, 0 }
  0x37   : > { %s1256_s9 = scalar_select %p597_p0, [#allocation4], [#allocation27] }
  0x38   : > { %s66_s27 = sshrl.u32 %s65_s18, 3  ;;  %s67_s15 = sand.u32 7, %s65_s18  }
  0x39   : > { %s68_s16 = smul.u32 24, %s66_s27  ;;  %s1258_s20 = sld [smem:[%s548_s23 + %s549_s5]] }
  0x3a   : > { %s1264_s7 = scalar_select %p597_p0, %s1936_s14, 0 }
  0x3b   : > { %s69_s17 = sadd.s32 %s68_s16, %s67_s15  ;;  %s79_s22 = sshrl.u32 %s1247_s28, 3 }
  0x3c   : > { %s471_s24 = sshll.u32 %s69_s17, 4  ;;  %s80_s29 = sand.u32 7, %s1247_s28  }
  0x3d   : > { %s1271_s13 = scalar_lea.hbm %s1928_s2, %s471_s24  ;;  %s1273_s18 = smul.u32 24, %s79_s22 }
  0x3e   : > { %s648_s27 = scalar_lea.hbm %s1271_s13, 48  ;;  %s1282_s15 = scalar_lea.hbm %s1928_s2, 768 }
  0x3f   : > { %p649_p1 = scmp.ne.s32.totalorder %s1271_s13, %s648_s27  ;;  %p653_p4 = scmp.lt.s32.totalorder %s1271_s13, %s1928_s2 }
  0x40   : > { %p654_p5 = scmp.lt.s32.totalorder %s1282_s15, %s648_s27 }
  0x41   : > { %p650_p2 = pnand %p649_p1, %p597_p0 }
  0x42   : > { %p655_p6 = por %p654_p5, %p653_p4 }
  0x43   : > { %p651_p3 = pneg %p650_p2 }
  0x45   : > { %p656_p7 = pnand %p655_p6, %p651_p3 }
  0x47   : > { %659 = shalt.err (!%p656_p7)  }
  0x48   : > { %s660_s21 = scalar_lea.vmem %s1219_s6, 48  ;;  %s1135_s26 = smov [#allocation6]  }
  0x49   : > { %p1291_p8 = scmp.ne.s32.totalorder %s1219_s6, %s660_s21  ;;  %s664_s22 = sshll.u32 %s1135_s26, 4  ;;  %s1299_s22 = int_to_ptr.vmem [resolvable:$false] %s664_s22 }
  0x4a   : > { %2002 = sst [smem:[#allocation54_spill]] %s1299_s22  ;;  %s1302_s27 = scalar_lea.vmem %s1299_s22, 768 }
  0x4b   : > { %s2000_s24 = scalar_select %p1291_p8, 1, 0 }
  0x4c   : > { %p662_p10 = pnand %p1291_p8, %p597_p0  ;;  %2003 = sst [smem:[#allocation55_spill]] %s1302_s27 }
  0x4d   : > { %2001 = sst [smem:[#allocation53_spill]] %s2000_s24  ;;  %p1945_p1 = scmp.lt.s32.totalorder %s1219_s6, %s1299_s22 }
  0x4e   : > { %p663_p12 = pneg %p662_p10  ;;  %p668_p2 = scmp.lt.s32.totalorder %s1302_s27, %s660_s21 }
  0x50   : > { %p1310_p3 = por %p668_p2, %p1945_p1 }
  0x52   : > { %s2004_s23 = scalar_select %p1310_p3, 1, 0 }
  0x53   : > { %p670_p4 = pnand %p1310_p3, %p663_p12 }
  0x54   : > { %2005 = sst [smem:[#allocation56_spill]] %s2004_s23 }
  0x55   : > { %673 = shalt.err (!%p670_p4)  }
  0x56   : > { %s1949_s5 = smov 128   ;;  %s1951_s16 = smov 1  }
  0x57   : > { %544 = dma.hbm_to_vmem [thread:$0]  (%p597_p0), %s1271_s13, 48, %s1219_s6, [#allocation2], %s1949_s5, %s1949_s5, %s1951_s16 }
  0x58   : > { %s82_s17 = sadd.s32 %s1273_s18, %s80_s29  ;;  %s93_s21 = sshrl.u32 %s1258_s20, 3 }
  0x59   : > { %s472_s26 = sshll.u32 %s82_s17, 4  ;;  %s94_s14 = sand.u32 7, %s1258_s20  }
  0x5a   : > { %s84_s25 = scalar_lea.hbm %s1928_s2, %s472_s26  ;;  %s95_s19 = smul.u32 24, %s93_s21 }
  0x5b   : > { %s674_s1 = scalar_lea.hbm %s84_s25, 48  ;;  %p679_p10 = scmp.lt.s32.totalorder %s84_s25, %s1928_s2 }
  0x5c   : > { %p675_p5 = scmp.ne.s32.totalorder %s84_s25, %s674_s1  ;;  %p680_p12 = scmp.lt.s32.totalorder %s1282_s15, %s674_s1 }
  0x5e   : > { %p676_p6 = pnand %p675_p5, %p597_p0  ;;  %p681_p2 = por %p680_p12, %p679_p10 }
  0x60   : > { %p677_p7 = pneg %p676_p6 }
  0x62   : > { %p682_p4 = pnand %p681_p2, %p677_p7 }
  0x64   : > { %685 = shalt.err (!%p682_p4)  }
  0x65   : > { %s686_s3 = scalar_lea.vmem %s1226_s10, 48  ;;  %p693_p13 = scmp.lt.s32.totalorder %s1226_s10, %s1299_s22 }
  0x66   : > { %p1339_p1 = scmp.ne.s32.totalorder %s1226_s10, %s686_s3  ;;  %p694_p10 = scmp.lt.s32.totalorder %s1302_s27, %s686_s3 }
  0x68   : > { %p688_p5 = pnand %p1339_p1, %p597_p0  ;;  %p1350_p7 = por %p694_p10, %p693_p13 }
  0x6a   : > { %p689_p6 = pneg %p688_p5 }
  0x6b   : > { %s2007_s1 = scalar_select %p1350_p7, 1, 0 }
  0x6c   : > { %p696_p12 = pnand %p1350_p7, %p689_p6 }
  0x6d   : > { %2008 = sst [smem:[#allocation57_spill]] %s2007_s1 }
  0x6e   : > { %699 = shalt.err (!%p696_p12)  }
  0x6f   : > { %547 = dma.hbm_to_vmem [thread:$0]  (%p597_p0), %s84_s25, 48, %s1226_s10, [#allocation2], %s1949_s5, %s1949_s5, %s1951_s16 }
  0x70   : > { %s96_s13 = sadd.s32 %s95_s19, %s94_s14  ;;  %s1364_s20 = sld [smem:[%s1256_s9 + %s1264_s7]] }
  0x71   : > { %s473_s28 = sshll.u32 %s96_s13, 4  ;;  %s2009_s29 = scalar_lea.vmem %s1209_s4, 3 [#allocation6] }
  0x72   : > { %s1368_s18 = sshll.u32 %s2009_s29, 4  ;;  %s98_s17 = scalar_lea.hbm %s1928_s2, %s473_s28  ;;  %s1420_s18 = int_to_ptr.vmem [resolvable:$true] %s1368_s18 }
  0x73   : > { %s127_s21 = scalar_lea.vmem %s1209_s4, 4 [#allocation6]  ;;  %s700_s26 = scalar_lea.hbm %s98_s17, 48 }
  0x74   : > { %p701_p13 = scmp.ne.s32.totalorder %s98_s17, %s700_s26  ;;  %p705_p5 = scmp.lt.s32.totalorder %s98_s17, %s1928_s2 }
  0x75   : > { %p706_p6 = scmp.lt.s32.totalorder %s1282_s15, %s700_s26 }
  0x76   : > { %p702_p2 = pnand %p701_p13, %p597_p0 }
  0x77   : > { %p707_p10 = por %p706_p6, %p705_p5 }
  0x78   : > { %p703_p4 = pneg %p702_p2 }
  0x7a   : > { %p708_p12 = pnand %p707_p10, %p703_p4 }
  0x7c   : > { %711 = shalt.err (!%p708_p12)  }
  0x7d   : > { %s712_s19 = scalar_lea.vmem %s1230_s11, 48  ;;  %p719_p9 = scmp.lt.s32.totalorder %s1230_s11, %s1299_s22 }
  0x7e   : > { %p1382_p11 = scmp.ne.s32.totalorder %s1230_s11, %s712_s19  ;;  %p720_p5 = scmp.lt.s32.totalorder %s1302_s27, %s712_s19 }
  0x80   : > { %s2010_s25 = scalar_select %p1382_p11, 1, 0 }
  0x81   : > { %p714_p13 = pnand %p1382_p11, %p597_p0  ;;  %p1393_p4 = por %p720_p5, %p719_p9 }
  0x82   : > { %2011 = sst [smem:[#allocation58_spill]] %s2010_s25 }
  0x83   : > { %p715_p2 = pneg %p714_p13 }
  0x84   : > { %s2012_s7 = scalar_select %p1393_p4, 1, 0 }
  0x85   : > { %p722_p6 = pnand %p1393_p4, %p715_p2 }
  0x86   : > { %2013 = sst [smem:[#allocation59_spill]] %s2012_s7 }
  0x87   : > { %725 = shalt.err (!%p722_p6)  }
  0x88   : > { %550 = dma.hbm_to_vmem [thread:$0]  (%p597_p0), %s98_s17, 48, %s1230_s11, [#allocation2], %s1949_s5, %s1949_s5, %s1951_s16 }
  0x89   : > { %s554_s14 = scalar_select %p597_p0, [#allocation4], [#allocation28] }
  0x8a   : > { %s2014_s9 = sadd.s32 4, %s1207_s30  ;;  %s107_s1 = sshrl.u32 %s1364_s20, 3 }
  0x8b   : > { %s2121_s9 = smov (!%p597_p0, %s2014_s9), 0  ;;  %s108_s13 = sand.u32 7, %s1364_s20  }
  0x8c   : > { %s109_s28 = smul.u32 24, %s107_s1  ;;  %s1413_s29 = sld [smem:[%s554_s14 + %s2121_s9]] }
  0x8d   : > { %s1417_s24 = scalar_select %p597_p0, [#allocation4], [#allocation29] }
  0x8e   : > { %s110_s23 = sadd.s32 %s109_s28, %s108_s13  ;;  %2015 = sst [smem:[#allocation60_spill]] %s1420_s18 }
  0x8f   : > { %s474_s26 = sshll.u32 %s110_s23, 4  ;;  %s129_s17 = sshll.u32 %s127_s21, 4  ;;  %s1461_s17 = int_to_ptr.vmem [resolvable:$true] %s129_s17 }
  0x90   : > { %s112_s5 = scalar_lea.hbm %s1928_s2, %s474_s26  ;;  %s1962_s16 = sadd.s32 5, %s1207_s30 }
  0x91   : > { %s726_s11 = scalar_lea.hbm %s112_s5, 48  ;;  %p731_p13 = scmp.lt.s32.totalorder %s112_s5, %s1928_s2 }
  0x92   : > { %p727_p9 = scmp.ne.s32.totalorder %s112_s5, %s726_s11  ;;  %p732_p2 = scmp.lt.s32.totalorder %s1282_s15, %s726_s11 }
  0x94   : > { %p728_p10 = pnand %p727_p9, %p597_p0  ;;  %p733_p5 = por %p732_p2, %p731_p13 }
  0x96   : > { %p729_p12 = pneg %p728_p10 }
  0x98   : > { %p734_p6 = pnand %p733_p5, %p729_p12 }
  0x9a   : > { %737 = shalt.err (!%p734_p6)  }
  0x9b   : > { %s738_s21 = scalar_lea.vmem %s1420_s18, 48  ;;  %p745_p11 = scmp.lt.s32.totalorder %s1420_s18, %s1299_s22 }
  0x9c   : > { %p1436_p4 = scmp.ne.s32.totalorder %s1420_s18, %s738_s21  ;;  %p746_p13 = scmp.lt.s32.totalorder %s1302_s27, %s738_s21 }
  0x9e   : > { %s2016_s9 = scalar_select %p1436_p4, 1, 0 }
  0x9f   : > { %p740_p9 = pnand %p1436_p4, %p597_p0  ;;  %p1447_p12 = por %p746_p13, %p745_p11 }
  0xa0   : > { %2017 = sst [smem:[#allocation61_spill]] %s2016_s9 }
  0xa1   : > { %p741_p10 = pneg %p740_p9 }
  0xa2   : > { %s2018_s11 = scalar_select %p1447_p12, 1, 0 }
  0xa3   : > { %p748_p2 = pnand %p1447_p12, %p741_p10 }
  0xa4   : > { %2019 = sst [smem:[#allocation62_spill]] %s2018_s11 }
  0xa5   : > { %751 = shalt.err (!%p748_p2)  }
  0xa6   : > { %s2020_s1 = smov 1   ;;  %s2021_s13 = smov 128  }
  0xa7   : > { %553 = dma.hbm_to_vmem [thread:$0]  (%p597_p0), %s112_s5, 48, %s1420_s18, [#allocation2], %s2021_s13, %s2021_s13, %s2020_s1 }
  0xa8   : > { %s121_s28 = sshrl.u32 %s1413_s29, 3  ;;  %s122_s23 = sand.u32 7, %s1413_s29  }
  0xa9   : > { %s123_s26 = smul.u32 24, %s121_s28  ;;  %2022 = sst [smem:[#allocation63_spill]] %s1461_s17 }
  0xaa   : > { %s558_s3 = scalar_select %p597_p0, %s1962_s16, 0 }
  0xab   : > { %s124_s19 = sadd.s32 %s123_s26, %s122_s23  ;;  %s141_s20 = scalar_lea.vmem %s1209_s4, 5 [#allocation6] }
  0xac   : > { %s475_s14 = sshll.u32 %s124_s19, 4  ;;  %s1469_s21 = sld [smem:[%s1417_s24 + %s558_s3]] }
  0xad   : > { %s126_s7 = scalar_lea.hbm %s1928_s2, %s475_s14  ;;  %s1966_s25 = sadd.s32 6, %s1207_s30 }
  0xae   : > { %s752_s5 = scalar_lea.hbm %s126_s7, 48  ;;  %p757_p9 = scmp.lt.s32.totalorder %s126_s7, %s1928_s2 }
  0xaf   : > { %p753_p11 = scmp.ne.s32.totalorder %s126_s7, %s752_s5  ;;  %p758_p10 = scmp.lt.s32.totalorder %s1282_s15, %s752_s5 }
  0xb1   : > { %p754_p5 = pnand %p753_p11, %p597_p0  ;;  %p759_p13 = por %p758_p10, %p757_p9 }
  0xb3   : > { %p755_p6 = pneg %p754_p5 }
  0xb5   : > { %p760_p2 = pnand %p759_p13, %p755_p6 }
  0xb7   : > { %763 = shalt.err (!%p760_p2)  }
  0xb8   : > { %s764_s24 = scalar_lea.vmem %s1461_s17, 48  ;;  %p771_p4 = scmp.lt.s32.totalorder %s1461_s17, %s1299_s22 }
  0xb9   : > { %p1483_p12 = scmp.ne.s32.totalorder %s1461_s17, %s764_s24  ;;  %p772_p9 = scmp.lt.s32.totalorder %s1302_s27, %s764_s24 }
  0xbb   : > { %s2023_s9 = scalar_select %p1483_p12, 1, 0 }
  0xbc   : > { %p766_p11 = pnand %p1483_p12, %p597_p0  ;;  %p1494_p6 = por %p772_p9, %p771_p4 }
  0xbd   : > { %2024 = sst [smem:[#allocation64_spill]] %s2023_s9 }
  0xbe   : > { %p767_p5 = pneg %p766_p11 }
  0xbf   : > { %s2025_s11 = scalar_select %p1494_p6, 1, 0 }
  0xc0   : > { %p774_p10 = pnand %p1494_p6, %p767_p5 }
  0xc1   : > { %2026 = sst [smem:[#allocation65_spill]] %s2025_s11 }
  0xc2   : > { %777 = shalt.err (!%p774_p10)  }
  0xc3   : > { %556 = dma.hbm_to_vmem [thread:$0]  (%p597_p0), %s126_s7, 48, %s1461_s17, [#allocation2], %s2021_s13, %s2021_s13, %s2020_s1 }
  0xc4   : > { %s560_s23 = scalar_select %p597_p0, [#allocation4], [#allocation30] }
  0xc5   : > { %s561_s26 = scalar_select %p597_p0, %s1966_s25, 0 }
  0xc6   : > { %s143_s3 = sshll.u32 %s141_s20, 4  ;;  %s155_s19 = scalar_lea.vmem %s1209_s4, 6 [#allocation6]  ;;  %s1521_s3 = int_to_ptr.vmem [resolvable:$true] %s143_s3 }
  0xc7   : > { %s135_s14 = sshrl.u32 %s1469_s21, 3  ;;  %s136_s5 = sand.u32 7, %s1469_s21  }
  0xc8   : > { %s137_s29 = smul.u32 24, %s135_s14  ;;  %s1515_s28 = sld [smem:[%s560_s23 + %s561_s26]] }
  0xc9   : > { %s1519_s24 = scalar_select %p597_p0, [#allocation4], [#allocation31] }
  0xca   : > { %s138_s16 = sadd.s32 %s137_s29, %s136_s5  ;;  %s157_s17 = sshll.u32 %s155_s19, 4  ;;  %s1564_s17 = int_to_ptr.vmem [resolvable:$true] %s157_s17 }
  0xcb   : > { %s476_s7 = sshll.u32 %s138_s16, 4  ;;  %s1974_s20 = sadd.s32 7, %s1207_s30 }
  0xcc   : > { %s140_s25 = scalar_lea.hbm %s1928_s2, %s476_s7 }
  0xcd   : > { %s778_s18 = scalar_lea.hbm %s140_s25, 48  ;;  %p783_p11 = scmp.lt.s32.totalorder %s140_s25, %s1928_s2 }
  0xce   : > { %p779_p4 = scmp.ne.s32.totalorder %s140_s25, %s778_s18  ;;  %p784_p5 = scmp.lt.s32.totalorder %s1282_s15, %s778_s18 }
  0xd0   : > { %p780_p13 = pnand %p779_p4, %p597_p0  ;;  %p785_p9 = por %p784_p5, %p783_p11 }
  0xd2   : > { %p781_p2 = pneg %p780_p13 }
  0xd4   : > { %p786_p10 = pnand %p785_p9, %p781_p2 }
  0xd6   : > { %789 = shalt.err (!%p786_p10)  }
  0xd7   : > { %s790_s16 = scalar_lea.vmem %s1521_s3, 48  ;;  %p797_p12 = scmp.lt.s32.totalorder %s1521_s3, %s1299_s22 }
  0xd8   : > { %p1535_p6 = scmp.ne.s32.totalorder %s1521_s3, %s790_s16  ;;  %p798_p11 = scmp.lt.s32.totalorder %s1302_s27, %s790_s16 }
  0xda   : > { %s2027_s9 = scalar_select %p1535_p6, 1, 0 }
  0xdb   : > { %p792_p4 = pnand %p1535_p6, %p597_p0  ;;  %p1546_p2 = por %p798_p11, %p797_p12 }
  0xdc   : > { %2028 = sst [smem:[#allocation66_spill]] %s2027_s9 }
  0xdd   : > { %p793_p13 = pneg %p792_p4 }
  0xde   : > { %s2029_s18 = scalar_select %p1546_p2, 1, 0 }
  0xdf   : > { %p800_p5 = pnand %p1546_p2, %p793_p13 }
  0xe0   : > { %2030 = sst [smem:[#allocation67_spill]] %s2029_s18 }
  0xe1   : > { %803 = shalt.err (!%p800_p5)  }
  0xe2   : > { %559 = dma.hbm_to_vmem [thread:$0]  (%p597_p0), %s140_s25, 48, %s1521_s3, [#allocation2], %s2021_s13, %s2021_s13, %s2020_s1 }
  0xe3   : > { %s149_s11 = sshrl.u32 %s1515_s28, 3  ;;  %s150_s26 = sand.u32 7, %s1515_s28  }
  0xe4   : > { %s151_s19 = smul.u32 24, %s149_s11  ;;  %s169_s18 = scalar_lea.vmem %s1209_s4, 7 [#allocation6] }
  0xe5   : > { %s564_s14 = scalar_select %p597_p0, %s1974_s20, 0 }
  0xe6   : > { %s152_s5 = sadd.s32 %s151_s19, %s150_s26 }
  0xe7   : > { %s477_s29 = sshll.u32 %s152_s5, 4  ;;  %s162_s7 = sld [smem:[%s1519_s24 + %s564_s14]] }
  0xe8   : > { %s154_s16 = scalar_lea.hbm %s1928_s2, %s477_s29 }
  0xe9   : > { %s804_s9 = scalar_lea.hbm %s154_s16, 48  ;;  %p809_p4 = scmp.lt.s32.totalorder %s154_s16, %s1928_s2 }
  0xea   : > { %p805_p12 = scmp.ne.s32.totalorder %s154_s16, %s804_s9  ;;  %p810_p13 = scmp.lt.s32.totalorder %s1282_s15, %s804_s9 }
  0xec   : > { %p806_p9 = pnand %p805_p12, %p597_p0  ;;  %p811_p11 = por %p810_p13, %p809_p4 }
  0xee   : > { %p807_p10 = pneg %p806_p9 }
  0xf0   : > { %p812_p5 = pnand %p811_p11, %p807_p10 }
  0xf2   : > { %815 = shalt.err (!%p812_p5)  }
  0xf3   : > { %s816_s4 = scalar_lea.vmem %s1564_s17, 48  ;;  %p823_p6 = scmp.lt.s32.totalorder %s1564_s17, %s1299_s22 }
  0xf4   : > { %p1579_p2 = scmp.ne.s32.totalorder %s1564_s17, %s816_s4  ;;  %p824_p4 = scmp.lt.s32.totalorder %s1302_s27, %s816_s4 }
  0xf6   : > { %s2031_s24 = scalar_select %p1579_p2, 1, 0 }
  0xf7   : > { %p818_p12 = pnand %p1579_p2, %p597_p0  ;;  %p1590_p10 = por %p824_p4, %p823_p6 }
  0xf9   : > { %p819_p9 = pneg %p818_p12 }
  0xfa   : > { %s2032_s9 = scalar_select %p1590_p10, 1, 0 }
  0xfb   : > { %p826_p13 = pnand %p1590_p10, %p819_p9 }
  0xfd   : > { %829 = shalt.err (!%p826_p13)  }
  0xfe   : > { %562 = dma.hbm_to_vmem [thread:$0]  (%p597_p0), %s154_s16, 48, %s1564_s17, [#allocation2], %s2021_s13, %s2021_s13, %s2020_s1 }
  0xff   : > { %s171_s11 = sshll.u32 %s169_s18, 4  ;;  %s163_s26 = sshrl.u32 %s162_s7, 3  ;;  %s1602_s11 = int_to_ptr.vmem [resolvable:$true] %s171_s11 }
 0x100   : > { %s164_s19 = sand.u32 7, %s162_s7   ;;  %s165_s14 = smul.u32 24, %s163_s26 }
 0x101   : > { %2033 = sst [smem:[#allocation68_spill]] %s1602_s11 }
 0x102   : > { %s166_s5 = sadd.s32 %s165_s14, %s164_s19 }
 0x103   : > { %s478_s29 = sshll.u32 %s166_s5, 4 }
 0x104   : > { %s168_s25 = scalar_lea.hbm %s1928_s2, %s478_s29 }
 0x105   : > { %s830_s28 = scalar_lea.hbm %s168_s25, 48  ;;  %p835_p12 = scmp.lt.s32.totalorder %s168_s25, %s1928_s2 }
 0x106   : > { %p831_p6 = scmp.ne.s32.totalorder %s168_s25, %s830_s28  ;;  %p836_p9 = scmp.lt.s32.totalorder %s1282_s15, %s830_s28 }
 0x108   : > { %p832_p11 = pnand %p831_p6, %p597_p0  ;;  %p837_p4 = por %p836_p9, %p835_p12 }
 0x10a   : > { %p833_p5 = pneg %p832_p11 }
 0x10c   : > { %p838_p13 = pnand %p837_p4, %p833_p5 }
 0x10e   : > { %841 = shalt.err (!%p838_p13)  }
 0x10f   : > { %s842_s18 = scalar_lea.vmem %s1602_s11, 48  ;;  %p849_p2 = scmp.lt.s32.totalorder %s1602_s11, %s1299_s22 }
 0x110   : > { %p1615_p10 = scmp.ne.s32.totalorder %s1602_s11, %s842_s18  ;;  %p850_p12 = scmp.lt.s32.totalorder %s1302_s27, %s842_s18 }
 0x112   : > { %s2034_s7 = scalar_select %p1615_p10, 1, 0 }
 0x113   : > { %p844_p6 = pnand %p1615_p10, %p597_p0  ;;  %p1626_p5 = por %p850_p12, %p849_p2 }
 0x115   : > { %p845_p11 = pneg %p844_p6 }
 0x116   : > { %s2035_s20 = scalar_select %p1626_p5, 1, 0 }
 0x117   : > { %p852_p9 = pnand %p1626_p5, %p845_p11 }
 0x118   : > { %2036 = sst [smem:[#allocation69_spill]] %s2035_s20 }
 0x119   : > { %855 = shalt.err (!%p852_p9)  }
 0x11a   : > { %565 = dma.hbm_to_vmem [thread:$0]  (%p597_p0), %s168_s25, 48, %s1602_s11, [#allocation2], %s2021_s13, %s2021_s13, %s2020_s1 }
 0x11b   : > { %1109 = dma.done.wait (%p597_p0), [#allocation2], 384 }
 0x11c   : > { %1111 = vsyncadd (%p597_p0), [#allocation2], 4294966912  ;;  %p2037_p2 = scmp.lt.s32.totalorder %s1215_s8, 8 }
 0x11d   : > { %p482_p4 = scmp.gt.s32.totalorder (%p2037_p2), %s1215_s8, 0  ;;  %p1984_p13 = scmp.gt.s32.totalorder (%p2037_p2), %s1215_s8, 1 }
 0x11e   : > { %182 = sbr.rel (!%p2037_p2) target bundleno = 557 (0x22d), region = 20  ;;  %p1983_p0 = scmp.gt.s32.totalorder (%p2037_p2), %s1215_s8, 2 }
 0x11f   : > { %s2038_s19 = sadd.s32 (%p2037_p2), 1, %s1207_s30  ;;  %p1982_p6 = scmp.gt.s32.totalorder (%p2037_p2), %s1215_s8, 3 }
 0x120   : > { %s2039_s29 = sadd.s32 (%p2037_p2), 2, %s1207_s30  ;;  %s2040_s18 = sadd.s32 (%p2037_p2), 3, %s1207_s30 }
 0x123   : > { %s567_s1 = scalar_select %p482_p4, [#allocation4], [#allocation32] }
 0x124   : > { %s568_s13 = scalar_select %p482_p4, %s1207_s30, 0 }
 0x125   : > { %s570_s16 = scalar_select %p1984_p13, [#allocation4], [#allocation33] }
 0x126   : > { %s187_s26 = sld [smem:[%s567_s1 + %s568_s13]]  ;;  %s2123_s19 = smov (!%p1984_p13, %s2038_s19), 0 }
 0x127   : > { %s573_s14 = scalar_select %p1983_p0, [#allocation4], [#allocation34] }
 0x128   : > { %s1660_s5 = sld [smem:[%s570_s16 + %s2123_s19]]  ;;  %s2125_s29 = smov (!%p1983_p0, %s2039_s29), 0 }
 0x129   : > { %s1669_s21 = scalar_select %p1982_p6, [#allocation4], [#allocation35] }
 0x12a   : > { %s1671_s4 = sld [smem:[%s573_s14 + %s2125_s29]]  ;;  %s2127_s18 = smov (!%p1982_p6, %s2040_s18), 0 }
 0x12c   : > { %s188_s23 = sshrl.u32 %s187_s26, 3  ;;  %s189_s25 = sand.u32 7, %s187_s26  }
 0x12d   : > { %s190_s28 = smul.u32 24, %s188_s23 }
 0x12e   : > { %s205_s13 = sshrl.u32 %s1660_s5, 3  ;;  %s206_s19 = sand.u32 7, %s1660_s5  }
 0x12f   : > { %s191_s1 = sadd.s32 %s190_s28, %s189_s25  ;;  %s207_s11 = smul.u32 24, %s205_s13 }
 0x130   : > { %s486_s16 = sshll.u32 %s191_s1, 4 }
 0x131   : > { %s193_s12 = scalar_lea.hbm %s1928_s2, %s486_s16 }
 0x132   : > { %s856_s20 = scalar_lea.hbm %s193_s12, 48  ;;  %p861_p2 = scmp.lt.s32.totalorder %s193_s12, %s1928_s2 }
 0x133   : > { %p857_p11 = scmp.ne.s32.totalorder %s193_s12, %s856_s20  ;;  %p862_p6 = scmp.lt.s32.totalorder %s1282_s15, %s856_s20 }
 0x135   : > { %p858_p12 = pnand %p857_p11, %p482_p4  ;;  %p863_p0 = por %p862_p6, %p861_p2 }
 0x137   : > { %p859_p9 = pneg %p858_p12 }
 0x139   : > { %p864_p13 = pnand %p863_p0, %p859_p9 }
 0x13b   : > { %867 = shalt.err (!%p864_p13)  }
 0x13c   : > { %p870_p5 = pnand %p1291_p8, %p482_p4 }
 0x13e   : > { %p871_p10 = pneg %p870_p5 }
 0x140   : > { %p878_p7 = pnand %p871_p10, %p1310_p3 }
 0x142   : > { %881 = shalt.err (!%p878_p7)  }
 0x143   : > { %s1138_s27 = smov 128   ;;  %s1139_s20 = smov 1  }
 0x144   : > { %569 = dma.hbm_to_vmem [thread:$0]  (%p482_p4), %s193_s12, 48, %s1219_s6, [#allocation2], %s1138_s27, %s1138_s27, %s1139_s20 }
 0x145   : > { %s208_s29 = sadd.s32 %s207_s11, %s206_s19  ;;  %s223_s23 = sshrl.u32 %s1671_s4, 3 }
 0x146   : > { %s491_s25 = sshll.u32 %s208_s29, 4  ;;  %s224_s28 = sand.u32 7, %s1671_s4  }
 0x147   : > { %s210_s16 = scalar_lea.hbm %s1928_s2, %s491_s25  ;;  %s225_s26 = smul.u32 24, %s223_s23 }
 0x148   : > { %s882_s14 = scalar_lea.hbm %s210_s16, 48  ;;  %p2043_p3 = scmp.gt.s32.totalorder %s1215_s8, 1 }
 0x149   : > { %p883_p8 = scmp.ne.s32.totalorder %s210_s16, %s882_s14  ;;  %p887_p5 = scmp.lt.s32.totalorder %s210_s16, %s1928_s2 }
 0x14a   : > { %p888_p13 = scmp.lt.s32.totalorder %s1282_s15, %s882_s14 }
 0x14b   : > { %p884_p7 = pnand %p883_p8, %p2043_p3 }
 0x14c   : > { %p889_p4 = por %p888_p13, %p887_p5 }
 0x14d   : > { %p885_p10 = pneg %p884_p7 }
 0x14f   : > { %p890_p0 = pnand %p889_p4, %p885_p10 }
 0x151   : > { %893 = shalt.err (!%p890_p0)  }
 0x152   : > { %p2044_p6 = pmov %p2043_p3  ;;  %s2045_s12 = sld [smem:[#allocation57_spill]] }
 0x154   : > { %p896_p11 = pnand %p1339_p1, %p2044_p6 }
 0x156   : > { %p897_p12 = pneg %p896_p11 }
 0x158   : > { %p2046_p9 = scmp.ne.s32.totalorder %s2045_s12, 0 }
 0x15a   : > { %p904_p2 = pnand %p897_p12, %p2046_p9 }
 0x15c   : > { %907 = shalt.err (!%p904_p2)  }
 0x15d   : > { %p2047_p8 = pmov %p2043_p3  ;;  %s226_s0 = sadd.s32 %s225_s26, %s224_s28 }
 0x15e   : > { %s240_s11 = sld [smem:[%s1669_s21 + %s2127_s18]]  ;;  %s496_s4 = sshll.u32 %s226_s0, 4 }
 0x15f   : > { %572 = dma.hbm_to_vmem [thread:$0]  (%p2047_p8), %s210_s16, 48, %s1226_s10, [#allocation2], %s1138_s27, %s1138_s27, %s1139_s20 }
 0x160   : > { %s228_s23 = scalar_lea.hbm %s1928_s2, %s496_s4  ;;  %p2048_p10 = scmp.gt.s32.totalorder %s1215_s8, 2 }
 0x161   : > { %s908_s25 = scalar_lea.hbm %s228_s23, 48  ;;  %p913_p4 = scmp.lt.s32.totalorder %s228_s23, %s1928_s2 }
 0x162   : > { %p909_p7 = scmp.ne.s32.totalorder %s228_s23, %s908_s25  ;;  %p914_p0 = scmp.lt.s32.totalorder %s1282_s15, %s908_s25 }
 0x164   : > { %p910_p5 = pnand %p909_p7, %p2048_p10  ;;  %p915_p6 = por %p914_p0, %p913_p4 }
 0x166   : > { %p911_p13 = pneg %p910_p5 }
 0x168   : > { %p916_p11 = pnand %p915_p6, %p911_p13 }
 0x16a   : > { %919 = shalt.err (!%p916_p11)  }
 0x16b   : > { %p2049_p12 = pmov %p2048_p10  ;;  %s2050_s10 = sld [smem:[#allocation58_spill]] }
 0x16c   : > { %s2052_s21 = sld [smem:[#allocation59_spill]] }
 0x171   : > { %p2051_p9 = scmp.ne.s32.totalorder %s2050_s10, 0 }
 0x172   : > { %p2053_p3 = scmp.ne.s32.totalorder %s2052_s21, 0 }
 0x173   : > { %p922_p2 = pnand %p2051_p9, %p2049_p12 }
 0x175   : > { %p923_p8 = pneg %p922_p2 }
 0x177   : > { %p930_p1 = pnand %p923_p8, %p2053_p3 }
 0x179   : > { %933 = shalt.err (!%p930_p1)  }
 0x17a   : > { %p2054_p7 = pmov %p2048_p10  ;;  %s2055_s18 = sld [smem:[#allocation52_spill]] }
 0x17b   : > { %p2056_p10 = scmp.gt.s32.totalorder %s1215_s8, 4  ;;  %s2057_s16 = sadd.s32 4, %s1207_s30 }
 0x17c   : > { %s241_s26 = sshrl.u32 %s240_s11, 3  ;;  %s242_s14 = sand.u32 7, %s240_s11  }
 0x17d   : > { %s579_s28 = scalar_select %p2056_p10, [#allocation4], [#allocation36] }
 0x17e   : > { %p2058_p5 = pmov %p2056_p10  ;;  %s243_s5 = smul.u32 24, %s241_s26 }
 0x17f   : > { %p2059_p1 = scmp.gt.s32.totalorder %s1215_s8, 5  ;;  %p2060_p13 = scmp.gt.s32.totalorder %s1215_s8, 3 }
 0x180   : > { %575 = dma.hbm_to_vmem [thread:$0]  (%p2054_p7), %s228_s23, 48, %s2055_s18, [#allocation2], %s1138_s27, %s1138_s27, %s1139_s20 }
 0x181   : > { %s2129_s16 = smov (!%p2058_p5, %s2057_s16), 0  ;;  %s244_s0 = sadd.s32 %s243_s5, %s242_s14 }
 0x182   : > { %s258_s22 = sld [smem:[%s579_s28 + %s2129_s16]]  ;;  %s501_s4 = sshll.u32 %s244_s0, 4 }
 0x183   : > { %s582_s12 = scalar_select %p2059_p1, [#allocation4], [#allocation37] }
 0x184   : > { %s246_s25 = scalar_lea.hbm %s1928_s2, %s501_s4 }
 0x185   : > { %s934_s1 = scalar_lea.hbm %s246_s25, 48  ;;  %p939_p6 = scmp.lt.s32.totalorder %s246_s25, %s1928_s2 }
 0x186   : > { %p935_p3 = scmp.ne.s32.totalorder %s246_s25, %s934_s1  ;;  %p940_p11 = scmp.lt.s32.totalorder %s1282_s15, %s934_s1 }
 0x188   : > { %p936_p4 = pnand %p935_p3, %p2060_p13  ;;  %p941_p12 = por %p940_p11, %p939_p6 }
 0x18a   : > { %p937_p0 = pneg %p936_p4 }
 0x18c   : > { %p942_p9 = pnand %p941_p12, %p937_p0 }
 0x18e   : > { %945 = shalt.err (!%p942_p9)  }
 0x18f   : > { %p2061_p2 = pmov %p2060_p13  ;;  %s2062_s11 = sld [smem:[#allocation61_spill]] }
 0x190   : > { %s2064_s10 = sld [smem:[#allocation62_spill]] }
 0x195   : > { %p2063_p8 = scmp.ne.s32.totalorder %s2062_s11, 0 }
 0x196   : > { %p2065_p5 = scmp.ne.s32.totalorder %s2064_s10, 0 }
 0x197   : > { %p948_p7 = pnand %p2063_p8, %p2061_p2 }
 0x199   : > { %p949_p10 = pneg %p948_p7 }
 0x19b   : > { %p956_p1 = pnand %p949_p10, %p2065_p5 }
 0x19d   : > { %959 = shalt.err (!%p956_p1)  }
 0x19e   : > { %p2066_p3 = pmov %p2061_p2  ;;  %s2067_s21 = sld [smem:[#allocation60_spill]] }
 0x19f   : > { %s259_s18 = sshrl.u32 %s258_s22, 3  ;;  %s260_s28 = sand.u32 7, %s258_s22  }
 0x1a0   : > { %s261_s16 = smul.u32 24, %s259_s18  ;;  %s2068_s26 = sadd.s32 5, %s1207_s30 }
 0x1a1   : > { %p2069_p13 = scmp.gt.s32.totalorder %s1215_s8, 5  ;;  %p2070_p11 = scmp.gt.s32.totalorder %s1215_s8, 4 }
 0x1a2   : > { %s262_s14 = sadd.s32 %s261_s16, %s260_s28 }
 0x1a3   : > { %s2131_s26 = smov (!%p2069_p13, %s2068_s26), 0  ;;  %s506_s5 = sshll.u32 %s262_s14, 4 }
 0x1a4   : > { %578 = dma.hbm_to_vmem [thread:$0]  (%p2066_p3), %s246_s25, 48, %s2067_s21, [#allocation2], %s1138_s27, %s1138_s27, %s1139_s20 }
 0x1a5   : > { %s276_s0 = sld [smem:[%s582_s12 + %s2131_s26]]  ;;  %s264_s29 = scalar_lea.hbm %s1928_s2, %s506_s5 }
 0x1a6   : > { %s960_s1 = scalar_lea.hbm %s264_s29, 48  ;;  %p965_p2 = scmp.lt.s32.totalorder %s264_s29, %s1928_s2 }
 0x1a7   : > { %p961_p6 = scmp.ne.s32.totalorder %s264_s29, %s960_s1  ;;  %p966_p8 = scmp.lt.s32.totalorder %s1282_s15, %s960_s1 }
 0x1a9   : > { %p962_p12 = pnand %p961_p6, %p2070_p11  ;;  %p967_p7 = por %p966_p8, %p965_p2 }
 0x1ab   : > { %p963_p9 = pneg %p962_p12 }
 0x1ad   : > { %p968_p10 = pnand %p967_p7, %p963_p9 }
 0x1af   : > { %971 = shalt.err (!%p968_p10)  }
 0x1b0   : > { %p2071_p5 = pmov %p2070_p11  ;;  %s2072_s12 = sld [smem:[#allocation64_spill]] }
 0x1b1   : > { %s2074_s23 = sld [smem:[#allocation65_spill]] }
 0x1b6   : > { %p2073_p1 = scmp.ne.s32.totalorder %s2072_s12, 0 }
 0x1b7   : > { %p2075_p0 = scmp.ne.s32.totalorder %s2074_s23, 0 }
 0x1b8   : > { %p974_p3 = pnand %p2073_p1, %p2071_p5 }
 0x1ba   : > { %p975_p13 = pneg %p974_p3 }
 0x1bc   : > { %p982_p4 = pnand %p975_p13, %p2075_p0 }
 0x1be   : > { %985 = shalt.err (!%p982_p4)  }
 0x1bf   : > { %p2076_p6 = pmov %p2071_p5  ;;  %s2077_s13 = sld [smem:[#allocation63_spill]] }
 0x1c0   : > { %p2078_p11 = scmp.gt.s32.totalorder %s1215_s8, 6  ;;  %s2079_s10 = sadd.s32 6, %s1207_s30 }
 0x1c1   : > { %p2081_p4 = scmp.gt.s32.totalorder %s1215_s8, 7  ;;  %s277_s18 = sshrl.u32 %s276_s0, 3 }
 0x1c2   : > { %s585_s11 = scalar_select %p2078_p11, [#allocation4], [#allocation38] }
 0x1c3   : > { %p2080_p12 = pmov %p2078_p11  ;;  %s278_s28 = sand.u32 7, %s276_s0  }
 0x1c4   : > { %s588_s21 = scalar_select %p2081_p4, [#allocation4], [#allocation39] }
 0x1c5   : > { %581 = dma.hbm_to_vmem [thread:$0]  (%p2076_p6), %s264_s29, 48, %s2077_s13, [#allocation2], %s1138_s27, %s1138_s27, %s1139_s20 }
 0x1c6   : > { %s2133_s10 = smov (!%p2080_p12, %s2079_s10), 0  ;;  %s279_s16 = smul.u32 24, %s277_s18 }
 0x1c7   : > { %s294_s26 = sld [smem:[%s585_s11 + %s2133_s10]]  ;;  %s2082_s14 = sadd.s32 7, %s1207_s30 }
 0x1c8   : > { %p2083_p0 = pmov %p2081_p4  ;;  %s280_s5 = sadd.s32 %s279_s16, %s278_s28 }
 0x1c9   : > { %s511_s4 = sshll.u32 %s280_s5, 4  ;;  %p2084_p2 = scmp.gt.s32.totalorder %s1215_s8, 5 }
 0x1ca   : > { %s2135_s14 = smov (!%p2083_p0, %s2082_s14), 0  ;;  %s282_s25 = scalar_lea.hbm %s1928_s2, %s511_s4 }
 0x1cb   : > { %s1818_s19 = sld [smem:[%s588_s21 + %s2135_s14]]  ;;  %s986_s22 = scalar_lea.hbm %s282_s25, 48 }
 0x1cc   : > { %p987_p9 = scmp.ne.s32.totalorder %s282_s25, %s986_s22  ;;  %p991_p10 = scmp.lt.s32.totalorder %s282_s25, %s1928_s2 }
 0x1cd   : > { %p992_p5 = scmp.lt.s32.totalorder %s1282_s15, %s986_s22 }
 0x1ce   : > { %p988_p8 = pnand %p987_p9, %p2084_p2 }
 0x1cf   : > { %p993_p1 = por %p992_p5, %p991_p10 }
 0x1d0   : > { %p989_p7 = pneg %p988_p8 }
 0x1d2   : > { %p994_p3 = pnand %p993_p1, %p989_p7 }
 0x1d4   : > { %997 = shalt.err (!%p994_p3)  }
 0x1d5   : > { %p2085_p13 = pmov %p2084_p2  ;;  %s2086_s30 = sld [smem:[#allocation66_spill]] }
 0x1d6   : > { %s2088_s23 = sld [smem:[#allocation67_spill]] }
 0x1db   : > { %p2087_p6 = scmp.ne.s32.totalorder %s2086_s30, 0 }
 0x1dc   : > { %p2089_p4 = scmp.ne.s32.totalorder %s2088_s23, 0 }
 0x1dd   : > { %p1000_p11 = pnand %p2087_p6, %p2085_p13 }
 0x1df   : > { %p1001_p12 = pneg %p1000_p11 }
 0x1e1   : > { %p1008_p0 = pnand %p1001_p12, %p2089_p4 }
 0x1e3   : > { %1011 = shalt.err (!%p1008_p0)  }
 0x1e4   : > { %p2090_p9 = pmov %p2084_p2  ;;  %s295_s13 = sshrl.u32 %s294_s26, 3 }
 0x1e5   : > { %s296_s11 = sand.u32 7, %s294_s26   ;;  %s297_s10 = smul.u32 24, %s295_s13 }
 0x1e6   : > { %584 = dma.hbm_to_vmem [thread:$0]  (%p2090_p9), %s282_s25, 48, %s1521_s3, [#allocation2], %s1138_s27, %s1138_s27, %s1139_s20 }
 0x1e7   : > { %s298_s21 = sadd.s32 %s297_s10, %s296_s11  ;;  %s313_s18 = sshrl.u32 %s1818_s19, 3 }
 0x1e8   : > { %s516_s28 = sshll.u32 %s298_s21, 4  ;;  %s314_s16 = sand.u32 7, %s1818_s19  }
 0x1e9   : > { %s300_s4 = scalar_lea.hbm %s1928_s2, %s516_s28  ;;  %s315_s29 = smul.u32 24, %s313_s18 }
 0x1ea   : > { %s1012_s1 = scalar_lea.hbm %s300_s4, 48  ;;  %p2091_p8 = scmp.gt.s32.totalorder %s1215_s8, 6 }
 0x1eb   : > { %p1013_p2 = scmp.ne.s32.totalorder %s300_s4, %s1012_s1  ;;  %p1017_p5 = scmp.lt.s32.totalorder %s300_s4, %s1928_s2 }
 0x1ec   : > { %p1018_p1 = scmp.lt.s32.totalorder %s1282_s15, %s1012_s1 }
 0x1ed   : > { %p1014_p7 = pnand %p1013_p2, %p2091_p8 }
 0x1ee   : > { %p1019_p3 = por %p1018_p1, %p1017_p5 }
 0x1ef   : > { %p1015_p10 = pneg %p1014_p7 }
 0x1f1   : > { %p1020_p13 = pnand %p1019_p3, %p1015_p10 }
 0x1f3   : > { %1023 = shalt.err (!%p1020_p13)  }
 0x1f4   : > { %p2092_p6 = pmov %p2091_p8  ;;  %p2093_p11 = scmp.ne.s32.totalorder %s2031_s24, 0 }
 0x1f5   : > { %p2094_p0 = scmp.ne.s32.totalorder %s2032_s9, 0 }
 0x1f6   : > { %p1026_p12 = pnand %p2093_p11, %p2092_p6 }
 0x1f8   : > { %p1027_p4 = pneg %p1026_p12 }
 0x1fa   : > { %p1034_p9 = pnand %p1027_p4, %p2094_p0 }
 0x1fc   : > { %1037 = shalt.err (!%p1034_p9)  }
 0x1fd   : > { %p2095_p2 = pmov %p2092_p6  ;;  %s316_s3 = sadd.s32 %s315_s29, %s314_s16 }
 0x1fe   : > { %s521_s26 = sshll.u32 %s316_s3, 4  ;;  %p2096_p7 = scmp.gt.s32.totalorder %s1215_s8, 7 }
 0x1ff   : > { %587 = dma.hbm_to_vmem [thread:$0]  (%p2095_p2), %s300_s4, 48, %s1564_s17, [#allocation2], %s1138_s27, %s1138_s27, %s1139_s20 }
 0x200   : > { %s318_s24 = scalar_lea.hbm %s1928_s2, %s521_s26 }
 0x201   : > { %s1038_s0 = scalar_lea.hbm %s318_s24, 48  ;;  %p1043_p1 = scmp.lt.s32.totalorder %s318_s24, %s1928_s2 }
 0x202   : > { %p1039_p8 = scmp.ne.s32.totalorder %s318_s24, %s1038_s0  ;;  %p1044_p3 = scmp.lt.s32.totalorder %s1282_s15, %s1038_s0 }
 0x204   : > { %p1040_p10 = pnand %p1039_p8, %p2096_p7  ;;  %p1045_p13 = por %p1044_p3, %p1043_p1 }
 0x206   : > { %p1041_p5 = pneg %p1040_p10 }
 0x208   : > { %p1046_p6 = pnand %p1045_p13, %p1041_p5 }
 0x20a   : > { %1049 = shalt.err (!%p1046_p6)  }
 0x20b   : > { %p2097_p11 = pmov %p2096_p7  ;;  %p2098_p12 = scmp.ne.s32.totalorder %s2034_s7, 0 }
 0x20c   : > { %s2099_s17 = sld [smem:[#allocation69_spill]] }
 0x20d   : > { %p1052_p4 = pnand %p2098_p12, %p2097_p11 }
 0x20f   : > { %p1053_p0 = pneg %p1052_p4 }
 0x212   : > { %p2100_p9 = scmp.ne.s32.totalorder %s2099_s17, 0 }
 0x214   : > { %p1060_p2 = pnand %p1053_p0, %p2100_p9 }
 0x216   : > { %1063 = shalt.err (!%p1060_p2)  }
 0x217   : > { %p2101_p8 = pmov %p2096_p7  ;;  %s2102_s23 = sld [smem:[#allocation68_spill]] }
 0x218   : > { %p536_p7 = scmp.le.s32.totalorder %s1215_s8, 0 }
 0x219   : > { %s1130_s15 = smov (!%p536_p7), 0  }
 0x21a   : > { %452 = sbr.rel (%p536_p7) target bundleno = 557 (0x22d), region = 115 }
 0x21d   : > { %590 = dma.hbm_to_vmem [thread:$0]  (%p2101_p8), %s318_s24, 48, %s2102_s23, [#allocation2], %s1138_s27, %s1138_s27, %s1139_s20 }
 0x21f LB: >> { %1112 = dma.done.wait [#allocation2], 48  ;;  %s1132_s15 = sphi %s1130_s15, %s328_s15  }
 0x220   : >> { %1113 = vsyncadd [#allocation2], 4294967248  ;;  %s328_s15 = sadd.s32 1, %s1132_s15   ;;  %s2103_s7 = sld [smem:[#allocation51_spill]] }
 0x226   : >> { %p327_p10 = scmp.ge.s32.totalorder %s328_s15, %s2103_s7 }
 0x228   : > { %330 = sbr.rel (!%p327_p10) target bundleno = 543 (0x21f), region = 121 }
 0x22d PF: > { %s2104_s13 = sld [smem:[#allocation46_spill]]  ;;  %s1064_s4 = scalar_lea.vmem %s1219_s6, 384 }
 0x22e   : > { %s2105_s11 = sld [smem:[#allocation45_spill]]  ;;  %p1065_p5 = scmp.ne.s32.totalorder %s1219_s6, %s1064_s4 }
 0x22f   : > { %s2106_s27 = sld [smem:[#allocation49_spill]] }
 0x230   : > { %s2107_s8 = sld [smem:[#allocation55_spill]] }
 0x231   : > { %s2108_s20 = sld [smem:[#allocation54_spill]] }
 0x232   : > { %s2109_s28 = sld [smem:[#allocation70_spill]] }
 0x233   : > { %s540_s10 = smul.u32 384, %s2104_s13 }
 0x234   : > { %s2110_s14 = sand.u32 1, %s2105_s11  }
 0x235   : > { %s334_s5 = scalar_lea.sflag [#allocation7], %s2110_s14  ;;  %p2111_p1 = scmp.ne.s32.totalorder %s2106_s27, 0 }
 0x236   : > { %p1072_p6 = scmp.lt.s32.totalorder %s2107_s8, %s1064_s4 }
 0x237   : > { %p1066_p3 = pnand %p1065_p5, %p2111_p1  ;;  %p2112_p11 = scmp.lt.s32.totalorder %s1219_s6, %s2108_s20 }
 0x238   : > { %s346_s16 = scalar_lea.hbm %s2109_s28, %s540_s10 }
 0x239   : > { %p1067_p13 = pneg %p1066_p3  ;;  %p1073_p12 = por %p1072_p6, %p2112_p11 }
 0x23b   : > { %p1074_p4 = pnand %p1073_p12, %p1067_p13 }
 0x23d   : > { %1077 = shalt.err (!%p1074_p4)
}
 0x23e   : > { %s1078_s29 = scalar_lea.hbm %s346_s16, 384  ;;  %s1082_s12 = scalar_lea.hbm %s2109_s28, 768 }
 0x23f   : > { %p1079_p0 = scmp.ne.s32.totalorder %s346_s16, %s1078_s29  ;;  %p1083_p8 = scmp.lt.s32.totalorder %s346_s16, %s2109_s28 }
 0x240   : > { %p1084_p7 = scmp.lt.s32.totalorder %s1082_s12, %s1078_s29 }
 0x241   : > { %p1080_p9 = pnand %p1079_p0, %p2111_p1 }
 0x242   : > { %p1085_p10 = por %p1084_p7, %p1083_p8 }
 0x243   : > { %p1081_p2 = pneg %p1080_p9 }
 0x245   : > { %p1086_p5 = pnand %p1085_p10, %p1081_p2 }
 0x247   : > { %1089 = shalt.err (!%p1086_p5)
}
 0x248   : > { %591 = dma.vmem_to_hbm [thread:$0]  (%p2111_p1), %s1219_s6, 384, %s346_s16, %s334_s5  }
 0x249 PF: > { %s2113_s19 = sld [smem:[#allocation46_spill]] }
 0x24a   : > { %s2114_s25 = sld [smem:[#allocation44_spill]] }
 0x24b   : > { %s2115_s24 = sld [smem:[#allocation50_spill]] }
 0x24f   : > { %p598_p3 = scmp.ge.s32.totalorder %s2113_s19, 1 }
 0x250   : > { %s360_s0 = sand.u32 1, %s2114_s25  }
 0x251   : > { %p2116_p13 = scmp.ne.s32.totalorder %s2115_s24, 0  ;;  %s361_s9 = scalar_lea.sflag [#allocation7], %s360_s0 }
 0x253   : > { %p594_p6 = pnand %p598_p3, %p2116_p13 }
 0x255   : > { %p595_p11 = pneg %p594_p6 }
 0x257   : > { %1115 = dma.done.wait (%p595_p11), %s361_s9, 384  }
 0x258   : > { %1117 = vsyncadd (%p595_p11), %s361_s9, 4294966912  ;;  %s2117_s1 = sld [smem:[#allocation47_spill]] }
 0x259   : > { %s2118_s0 = sld [smem:[#allocation45_spill]] }
 0x25a   : > { %s2119_s19 = sld [smem:[#allocation48_spill]] }
 0x25e   : > { %p20_p12 = scmp.ge.s32.totalorder %s2117_s1, 3  }
 0x260   :  { %22 = sbr.rel (!%p20_p12) target bundleno = 19 (0x13), region = 132 }
 0x265   :  { %366 = vsyncpa [#allocation7], 1 }
 0x266   :  { %368 = vsyncpa [#allocation7 + $0x1], 1 }
 0x267   :  { %369 = vsyncmov [#allocation2] }
 0x26a   :  { %s370_s6 = vpop.sfrf %369 }
 0x26b   :  { %p526_p1 = scmp.ne.s32.totalorder %s370_s6, 0 }
 0x26d   :  { %374 = shalt.err (%p526_p1)  }

</bundles_post_ra>
